<compile_context>
chip_gen: v7x
topology: tpu7x:2x2x1
jax: 0.10.0
libtpu: 0.0.40
codegen_flags: <defaults>
</compile_context>

<pallas_src>
import functools
from dataclasses import dataclass
from typing import List, Optional, Tuple, Union

import jax
import jax.numpy as jnp
from jax.experimental import pallas as pl
from jax.experimental.pallas import tpu as pltpu


# ----------------------------------------------------------------------------
# Config dataclasses (copied from the reference module)
# ----------------------------------------------------------------------------
@dataclass
class IdentityConfig:
    in_channels: int
    out_channels: int
    stride: int


@dataclass
class MixVarGENetConfig:
    in_channels: int
    out_channels: int
    head_op: str
    stack_ops: List[str]
    stride: int
    stack_factor: Optional[int] = 1
    fusion_strides: Optional[Union[Tuple[int], List[int]]] = ()
    extra_downsample_num: Optional[int] = 0


# ----------------------------------------------------------------------------
# Tiling helpers
# ----------------------------------------------------------------------------
_BLOCK_M = 4096          # max rows per M tile (A tile at K<=144 is ~1.1 MiB bf16)
_SINGLE_TILE_M = 256     # below this, a single tile (splitting only adds step overhead)
_VMEM_LIMIT = 32 * 1024 * 1024


def _round_up(x, m):
    return (x + m - 1) // m * m


def _choose_tile_m(M):
    """Big M tiles, >=2 tiles when worthwhile (v7x megacore), ragged last block OK."""
    if M <= _SINGLE_TILE_M or M % 8 != 0:
        return M                                   # block == full dim is always legal
    n_tiles = max(2, pl.cdiv(M, _BLOCK_M))         # keep >=2 tiles for the 2-TC v7x
    return _round_up(pl.cdiv(M, n_tiles), 8)


# ----------------------------------------------------------------------------
# Pallas kernels
# ----------------------------------------------------------------------------
def _gemm_bias_kernel(a_ref, b_ref, c_ref, o_ref, *, relu):
    """out = relu_opt(A @ B + bias); B already has BN scale folded in."""
    acc = jnp.dot(a_ref[...], b_ref[...], preferred_element_type=jnp.float32)
    y = acc + c_ref[...]
    if relu:
        y = jnp.maximum(y, 0.0)
    o_ref[...] = y.astype(o_ref.dtype)


def _unit_kernel(*refs, has_sc):
    """Fused MixVarGE unit:
         y   = relu(A1 @ B1 + c1)              (grouped 3x3 conv1, block-diag B1)
         acc = y @ B2 + c2                     (1x1 conv2)
         sc  = Xs @ Bsc + csc  (or residual)   (1x1 shortcut / identity)
         out = relu(acc + sc)
       y and sc never leave VMEM/vregs."""
    if has_sc:
        a1_ref, xs_ref, b1_ref, c1_ref, b2_ref, c2_ref, bsc_ref, csc_ref, o_ref = refs
    else:
        a1_ref, r_ref, b1_ref, c1_ref, b2_ref, c2_ref, o_ref = refs

    y = jnp.dot(a1_ref[...], b1_ref[...], preferred_element_type=jnp.float32)
    y = jnp.maximum(y + c1_ref[...], 0.0).astype(jnp.bfloat16)

    acc = jnp.dot(y, b2_ref[...], preferred_element_type=jnp.float32) + c2_ref[...]

    if has_sc:
        acc = acc + jnp.dot(xs_ref[...], bsc_ref[...],
                            preferred_element_type=jnp.float32) + csc_ref[...]
    else:
        acc = acc + r_ref[...].astype(jnp.float32)

    o_ref[...] = jnp.maximum(acc, 0.0).astype(o_ref.dtype)


# ----------------------------------------------------------------------------
# Host-side helpers: im2col, weight folding, parameter construction
# ----------------------------------------------------------------------------
def _im2col_3x3(x_bf16, stride, pad):
    """NHWC -> (M, 9*C) patches in tap-major / channel-minor K layout."""
    N, H, W, C = x_bf16.shape
    Ho = (H + 2 * pad - 3) // stride + 1
    Wo = (W + 2 * pad - 3) // stride + 1
    xp = jnp.pad(x_bf16, ((0, 0), (pad, pad), (pad, pad), (0, 0)))
    cols = []
    for i in range(3):
        for j in range(3):
            cols.append(xp[:, i:i + stride * Ho:stride,
                           j:j + stride * Wo:stride, :])
    a = jnp.stack(cols, axis=3)                    # (N, Ho, Wo, 9, C)
    return a.reshape(N * Ho * Wo, 9 * C), Ho, Wo


def _fold_conv_weight(w, scale, groups):
    """OIHW weight + per-out-channel BN scale -> dense block-diagonal GEMM
    weight (k*k*Cin, Cout), tap-major / channel-minor K layout, bf16."""
    cout, cpg, kh, kw = w.shape
    cin = cpg * groups
    opg = cout // groups
    B = jnp.zeros((kh * kw, cin, cout), jnp.float32)
    for g in range(groups):
        wg = w[g * opg:(g + 1) * opg]                          # (opg, cpg, kh, kw)
        wg = jnp.transpose(wg, (2, 3, 1, 0)).reshape(kh * kw, cpg, opg)
        B = B.at[:, g * cpg:(g + 1) * cpg, g * opg:(g + 1) * opg].set(wg)
    B = B.reshape(kh * kw * cin, cout) * scale.reshape(1, cout)
    return B.astype(jnp.bfloat16)


def make_conv_gemm_params(key, cin, cout, k, groups):
    """Random conv + BN params, pre-folded into GEMM-ready (B, bias)."""
    k1, k2, k3, k4, k5 = jax.random.split(key, 5)
    w = jax.random.normal(k1, (cout, cin // groups, k, k), jnp.float32) * 0.1
    gamma = 1.0 + 0.1 * jax.random.normal(k2, (cout,), jnp.float32)
    beta = 0.1 * jax.random.normal(k3, (cout,), jnp.float32)
    mean = 0.1 * jax.random.normal(k4, (cout,), jnp.float32)
    var = 1.0 + 0.1 * jnp.abs(jax.random.normal(k5, (cout,), jnp.float32))
    eps = 1e-5
    scale = gamma / jnp.sqrt(var + eps)
    bias = beta - mean * scale
    return {
        "B": _fold_conv_weight(w, scale, groups),
        "bias": bias.reshape(1, cout).astype(jnp.float32),
        "w_raw": w, "scale_raw": scale,            # kept only for self-check
    }


def parse_block_op(name):
    """'mixvarge_f2', 'mixvarge_f4_gb16', ... -> (factor, group_base)."""
    parts = name.split("_")
    factor, gb = 2, 8
    for p in parts[1:]:
        if p.startswith("f"):
            factor = int(p[1:])
        elif p.startswith("gb"):
            gb = int(p[2:])
    return factor, gb


def make_unit_params(key, cin, cout, factor, group_base, stride):
    mid = cin * factor
    groups = cin // group_base if cin % group_base == 0 else 1
    groups = max(1, groups)
    k1, k2, k3 = jax.random.split(key, 3)
    unit = {
        "conv1": make_conv_gemm_params(k1, cin, mid, 3, groups),
        "conv2": make_conv_gemm_params(k2, mid, cout, 1, 1),
        "shortcut": None,
        "stride": stride,
    }
    if stride != 1 or cin != cout:
        unit["shortcut"] = make_conv_gemm_params(k3, cin, cout, 1, 1)
    return unit


def init_mixvargenet(key, net_config, num_classes, fc_filter, input_channels):
    params = {}
    key, k = jax.random.split(key)
    params["mod1"] = make_conv_gemm_params(
        k, input_channels, net_config[0][0].in_channels, 3, 1)

    stages = []
    for stage_cfg in net_config:
        blocks = []
        for cfg in stage_cfg:
            if isinstance(cfg, IdentityConfig):
                blocks.append(None)                  # nn.Identity()
                continue
            factor, gb = parse_block_op(cfg.head_op)
            key, k = jax.random.split(key)
            block = {
                "head": make_unit_params(k, cfg.in_channels, cfg.out_channels,
                                         factor, gb, cfg.stride),
                "stacks": [],
            }
            for op in (cfg.stack_ops or []):
                f2, gb2 = parse_block_op(op)
                key, k = jax.random.split(key)
                block["stacks"].append(make_unit_params(
                    k, cfg.out_channels, cfg.out_channels, f2, gb2, 1))
            blocks.append(block)
        stages.append(blocks)
    params["stages"] = stages

    last_ch = net_config[-1][-1].out_channels
    key, k1 = jax.random.split(key)
    key, k2 = jax.random.split(key)
    params["head_fc"] = make_conv_gemm_params(k1, last_ch, fc_filter, 1, 1)
    params["head_cls"] = make_conv_gemm_params(k2, fc_filter, num_classes, 1, 1)
    return params


# ----------------------------------------------------------------------------
# Forward-pass wrappers around pallas_call
# ----------------------------------------------------------------------------
def conv_gemm(x, p, *, k, stride, pad, relu, out_dtype=jnp.bfloat16):
    """Single conv (+folded BN, optional ReLU) as one Pallas GEMM. NHWC in/out."""
    N, H, W, C = x.shape
    xb = x.astype(jnp.bfloat16)
    if k == 1:
        Ho, Wo = H, W
        a = xb.reshape(N * H * W, C)                 # 1x1 conv: no im2col
    else:
        a, Ho, Wo = _im2col_3x3(xb, stride, pad)
    M = N * Ho * Wo
    Kt = a.shape[1]
    Cout = p["B"].shape[1]

    tile_m = _choose_tile_m(M)
    grid = (pl.cdiv(M, tile_m),)
    out = pl.pallas_call(
        functools.partial(_gemm_bias_kernel, relu=relu),
        out_shape=jax.ShapeDtypeStruct((M, Cout), out_dtype),
        grid=grid,
        in_specs=[pl.BlockSpec((tile_m, Kt), lambda m: (m, 0)),
                  pl.BlockSpec((Kt, Cout), lambda m: (0, 0)),     # VMEM-resident
                  pl.BlockSpec((1, Cout), lambda m: (0, 0))],
        out_specs=pl.BlockSpec((tile_m, Cout), lambda m: (m, 0)),
        compiler_params=pltpu.CompilerParams(
            dimension_semantics=("parallel",),
            vmem_limit_bytes=_VMEM_LIMIT),
    )(a, p["B"], p["bias"])
    return out[:M].reshape(N, Ho, Wo, Cout) if False else out.reshape(N, Ho, Wo, Cout)


def unit_forward(u, x):
    """One fused MixVarGE unit = one pallas_call."""
    s = u["stride"]
    N, H, W, C = x.shape
    xb = x.astype(jnp.bfloat16)
    a1, Ho, Wo = _im2col_3x3(xb, s, 1)
    M = N * Ho * Wo
    K1 = a1.shape[1]
    mid = u["conv1"]["B"].shape[1]
    Cout = u["conv2"]["B"].shape[1]

    has_sc = u["shortcut"] is not None
    if has_sc:
        res = xb[:, ::s, ::s, :].reshape(M, C)       # shortcut's 1x1-conv input
        res_w = C
        args = [a1, res, u["conv1"]["B"], u["conv1"]["bias"],
                u["conv2"]["B"], u["conv2"]["bias"],
                u["shortcut"]["B"], u["shortcut"]["bias"]]
    else:
        res = xb.reshape(M, Cout)                    # identity residual
        res_w = Cout
        args = [a1, res, u["conv1"]["B"], u["conv1"]["bias"],
                u["conv2"]["B"], u["conv2"]["bias"]]

    tile_m = _choose_tile_m(M)
    grid = (pl.cdiv(M, tile_m),)
    in_specs = [
        pl.BlockSpec((tile_m, K1), lambda m: (m, 0)),
        pl.BlockSpec((tile_m, res_w), lambda m: (m, 0)),
        pl.BlockSpec((K1, mid), lambda m: (0, 0)),       # weights/bias stay resident
        pl.BlockSpec((1, mid), lambda m: (0, 0)),
        pl.BlockSpec((mid, Cout), lambda m: (0, 0)),
        pl.BlockSpec((1, Cout), lambda m: (0, 0)),
    ]
    if has_sc:
        in_specs += [pl.BlockSpec((C, Cout), lambda m: (0, 0)),
                     pl.BlockSpec((1, Cout), lambda m: (0, 0))]

    out = pl.pallas_call(
        functools.partial(_unit_kernel, has_sc=has_sc),
        out_shape=jax.ShapeDtypeStruct((M, Cout), jnp.bfloat16),
        grid=grid,
        in_specs=in_specs,
        out_specs=pl.BlockSpec((tile_m, Cout), lambda m: (m, 0)),
        compiler_params=pltpu.CompilerParams(
            dimension_semantics=("parallel",),
            vmem_limit_bytes=_VMEM_LIMIT),
    )(*args)
    return out.reshape(N, Ho, Wo, Cout)


def avg_pool7(x):
    """AvgPool2d(7, stride=1), NHWC. Folds to a global mean on 7x7 maps."""
    N, H, W, C = x.shape
    if H == 7 and W == 7:
        return jnp.mean(x.astype(jnp.float32), axis=(1, 2), keepdims=True)
    y = jax.lax.reduce_window(x.astype(jnp.float32), 0.0, jax.lax.add,
                              (1, 7, 7, 1), (1, 1, 1, 1), "VALID")
    return y / 49.0


def mixvargenet_forward(params, x_nchw, num_classes):
    # QuantStub is identity in float mode.
    x = jnp.transpose(x_nchw, (0, 2, 3, 1))          # NCHW -> NHWC
    x = conv_gemm(x, params["mod1"], k=3, stride=2, pad=1, relu=False)

    outputs = []
    for stage in params["stages"]:
        for block in stage:
            if block is None:                        # nn.Identity
                continue
            x = unit_forward(block["head"], x)
            for u in block["stacks"]:
                x = unit_forward(u, x)
        outputs.append(x)                            # output_list == () -> all

    # include_top head: 1x1 conv+BN+ReLU -> AvgPool2d(7) -> 1x1 conv+BN
    x = conv_gemm(x, params["head_fc"], k=1, stride=1, pad=0, relu=True)
    x = avg_pool7(x)
    x = conv_gemm(x, params["head_cls"], k=1, stride=1, pad=0, relu=False,
                  out_dtype=jnp.float32)
    # DeQuantStub is identity; flat_output -> view(-1, num_classes)
    x = jnp.transpose(x, (0, 3, 1, 2))               # back to NCHW
    return x.reshape(-1, num_classes)


# ----------------------------------------------------------------------------
# Layout self-check (grouped 3x3 conv GEMM vs lax.conv_general_dilated)
# ----------------------------------------------------------------------------
def _layout_self_check():
    key = jax.random.PRNGKey(42)
    kx, kp = jax.random.split(key)
    cin, cout, groups, stride = 8, 16, 2, 2
    x = jax.random.normal(kx, (1, 14, 14, cin), jnp.float32)
    p = make_conv_gemm_params(kp, cin, cout, 3, groups)
    out = conv_gemm(x, p, k=3, stride=stride, pad=1, relu=False,
                    out_dtype=jnp.float32)
    w_eff = (p["w_raw"] * p["scale_raw"].reshape(-1, 1, 1, 1)
             ).astype(jnp.bfloat16).astype(jnp.float32)
    ref = jax.lax.conv_general_dilated(
        x.astype(jnp.bfloat16).astype(jnp.float32), w_eff,
        window_strides=(stride, stride), padding=((1, 1), (1, 1)),
        dimension_numbers=("NHWC", "OIHW", "NHWC"),
        feature_group_count=groups)
    ref = ref + p["bias"].reshape(1, 1, 1, -1)
    err = float(jnp.max(jnp.abs(out - ref)))
    assert err < 3e-2, f"conv layout self-check failed, max|err|={err}"


# ----------------------------------------------------------------------------
# Demo
# ----------------------------------------------------------------------------
if __name__ == "__main__":
    _layout_self_check()

    num_classes = 10
    fc_filter = 32
    input_channels = 3

    net_config = [
        [MixVarGENetConfig(8, 8, "mixvarge_f2", [], stride=2)],
        [MixVarGENetConfig(8, 16, "mixvarge_f2", ["mixvarge_f2"], stride=2)],
        [MixVarGENetConfig(16, 16, "mixvarge_f4", ["mixvarge_f2_gb16"],
                           stride=2)],
    ]

    key = jax.random.PRNGKey(0)
    key_params, key_x = jax.random.split(key)
    params = init_mixvargenet(key_params, net_config, num_classes, fc_filter,
                              input_channels)

    # 112x112 input: stem /2 -> 56, three /2 stages -> 7x7 before AvgPool2d(7)
    x = jax.random.normal(key_x, (2, 3, 112, 112), jnp.float32)

    # jit via closure so Python-int config (strides/groups/tiles) stays static.
    fwd = jax.jit(lambda inp: mixvargenet_forward(params, inp, num_classes))
    out = jax.block_until_ready(fwd(x))

    assert out.shape == (2, num_classes), out.shape
    assert jnp.all(jnp.isfinite(out))
    print("KERNEL_OK")
</pallas_src>

<mosaic_0001>
module attributes {stable_mosaic.version = 11 : i64} {
  func.func @_gemm_bias_kernel(%arg0: i32, %arg1: memref<49x72xbf16, #tpu.memory_space<vmem>>, %arg2: memref<72x16xbf16, #tpu.memory_space<vmem>>, %arg3: memref<1x16xf32, #tpu.memory_space<vmem>>, %arg4: memref<49x16xf32, #tpu.memory_space<vmem>>) attributes {dimension_semantics = [#tpu.dimension_semantics<parallel>], iteration_bounds = array<i64: 1>, scalar_prefetch = 0 : i64, scratch_operands = 0 : i64, tpu.core_type = #tpu.core_type<tc>, window_params = [{transform_indices = @transform_0, window_bounds = array<i64: 49, 72>}, {pipeline_mode = #tpu.pipeline_mode<synchronous>, transform_indices = @transform_1, window_bounds = array<i64: 72, 16>}, {pipeline_mode = #tpu.pipeline_mode<synchronous>, transform_indices = @transform_2, window_bounds = array<i64: 1, 16>}, {transform_indices = @transform_3, window_bounds = array<i64: 49, 16>}]} {
    %c0 = arith.constant 0 : index
    %c0_0 = arith.constant 0 : index
    %0 = vector.load %arg1[%c0, %c0_0] : memref<49x72xbf16, #tpu.memory_space<vmem>>, vector<49x72xbf16>
    %c0_1 = arith.constant 0 : index
    %c0_2 = arith.constant 0 : index
    %1 = vector.load %arg2[%c0_1, %c0_2] : memref<72x16xbf16, #tpu.memory_space<vmem>>, vector<72x16xbf16>
    %cst = arith.constant dense<0.000000e+00> : vector<49x16xf32>
    %2 = tpu.matmul %0, %1, %cst {dimension_numbers = #tpu.dot_dimension_numbers<[1], [0], [0], [1], [0, 0, 1, 1], [], []>} : vector<49x72xbf16>, vector<72x16xbf16>, vector<49x16xf32> -> vector<49x16xf32>
    %c0_3 = arith.constant 0 : index
    %c0_4 = arith.constant 0 : index
    %3 = vector.load %arg3[%c0_3, %c0_4] : memref<1x16xf32, #tpu.memory_space<vmem>>, vector<1x16xf32>
    %4 = vector.broadcast %3 : vector<1x16xf32> to vector<49x16xf32>
    %5 = arith.addf %2, %4 : vector<49x16xf32>
    %c0_5 = arith.constant 0 : index
    %c0_6 = arith.constant 0 : index
    %6 = vector.load %arg4[%c0_5, %c0_6] : memref<49x16xf32, #tpu.memory_space<vmem>>, vector<49x16xf32>
    tpu.vector_store %arg4[%c0_5, %c0_6], %5 {strides = array<i32>} : memref<49x16xf32, #tpu.memory_space<vmem>>, vector<49x16xf32>,
    return
  }
  func.func @transform_0(%arg0: i32) -> (i32, i32) {
    %c0_i32 = arith.constant 0 : i32
    %c0_i32_0 = arith.constant 0 : i32
    return %arg0, %c0_i32 : i32, i32
  }
  func.func @transform_1(%arg0: i32) -> (i32, i32) {
    %c0_i32 = arith.constant 0 : i32
    %c0_i32_0 = arith.constant 0 : i32
    %c0_i32_1 = arith.constant 0 : i32
    return %c0_i32, %c0_i32_0 : i32, i32
  }
  func.func @transform_2(%arg0: i32) -> (i32, i32) {
    %c0_i32 = arith.constant 0 : i32
    %c0_i32_0 = arith.constant 0 : i32
    %c0_i32_1 = arith.constant 0 : i32
    return %c0_i32, %c0_i32_0 : i32, i32
  }
  func.func @transform_3(%arg0: i32) -> (i32, i32) {
    %c0_i32 = arith.constant 0 : i32
    %c0_i32_0 = arith.constant 0 : i32
    return %arg0, %c0_i32 : i32, i32
  }
}

</mosaic_0001>

<bundles_post_ra>
// kernel: tpu_custom_call.1
= control target key start
LH: loop header
LB: loop body
LE: loop exit
PB: predicated region body
PF: predicated region fallthrough
CT: control target
= control target key end

     0   :  { %vm83_vm0 = vcmask 588800   ;;  %vm96_vm1 = vcmask 1043456   ;;  %vm164_vm2 = vcmask 130048   ;;  %vm171_vm3 = vcmask 122880   ;;  %s320_s1 = inlined_call_operand.vmem [shape: bf16[72,16], index: 1, kind: input, shape index: {}]   ;;  %s321_s0 = inlined_call_operand.vmem [shape: bf16[49,72], index: 0, kind: input, shape index: {}]   ;;  %s322_s2 = inlined_call_operand.vmem [shape: f32[1,16], index: 2, kind: input, shape index: {}]   ;;  %s323_s3 = inlined_call_operand.vmem [shape: f32[49,16], index: 3, kind: output, shape index: {}]  }
   0x1   :  { %v230_v0 = vld [vmem:[%s320_s1] sm:$0xff]   ;;  %v231_v1 = vld [vmem:[%s320_s1 + $0x8] sm:$0xff]   ;;  %v232_v2 = vld [vmem:[%s320_s1 + $0x10] sm:$0xff]  }
   0x2   :  { %200 = vmatprep.subr.bf16.mxu0 %v230_v0  ;;  %218 = vmatprep.subr.bf16.mxu1 %v230_v0  ;;  %v235_v3 = vld [vmem:[%s321_s0] sm:$0xff]   ;;  %v236_v4 = vld [vmem:[%s321_s0 + $0x10] sm:$0xff]   ;;  %v233_v5 = vld [vmem:[%s320_s1 + $0x18] sm:$0xff]  }
   0x3   :  { %201 = vmatpush3.bf16.msra.mxu0 %v230_v0  ;;  %223 = vmatpush3.bf16.msra.mxu1 %v230_v0  ;;  %v234_v6 = vld [vmem:[%s320_s1 + $0x20] ss:$0 sps:$4 sm:$0xff]   ;;  %v237_v8 = vld [vmem:[%s321_s0 + $0x8] sm:$0xff]   ;;  %v238_v9 = vld [vmem:[%s321_s0 + $0x18] ss:$0 sps:$4 sm:$0x11]  }
   0x4   :  { %202 = vmatprep.subr.bf16.mxu0 %v231_v1  ;;  %219 = vmatprep.subr.bf16.mxu1 %v231_v1  ;;  %v98_v7 = vsel %vm96_vm1, %v234_v6, 0  ;;  %v177_v10 = vld [vmem:[%s322_s2] ss:$0 sm:$0xff] }
   0x5   :  { %210 = vmatprep.mubr.msk.bf16.mxu0 %vm83_vm0, %v235_v3  ;;  %214 = vmatprep.mubr.msk.bf16.mxu1 %vm83_vm0, %v236_v4 }
   0x7   :  { %203 = vmatpush3.bf16.msra.mxu0 %v231_v1  ;;  %224 = vmatpush3.bf16.msra.mxu1 %v231_v1 }
   0x8   :  { %204 = vmatprep.subr.bf16.mxu0 %v232_v2  ;;  %220 = vmatprep.subr.bf16.mxu1 %v232_v2 }
   0xb   :  { %205 = vmatpush3.bf16.msra.mxu0 %v232_v2  ;;  %225 = vmatpush3.bf16.msra.mxu1 %v232_v2 }
   0xc   :  { %206 = vmatprep.subr.bf16.mxu0 %v233_v5  ;;  %221 = vmatprep.subr.bf16.mxu1 %v233_v5 }
   0xf   :  { %207 = vmatpush3.bf16.msra.mxu0 %v233_v5  ;;  %226 = vmatpush3.bf16.msra.mxu1 %v233_v5 }
  0x10   :  { %228 = vmatprep.subr.msk.bf16.mxu0 %vm96_vm1, %v234_v6  ;;  %229 = vmatprep.subr.msk.bf16.mxu1 %vm96_vm1, %v234_v6 }
  0x13   :  { %209 = vmatpush3.bf16.msra.mxu0 %v98_v7  ;;  %227 = vmatpush3.bf16.msra.mxu1 %v98_v7 }
  0x16   :  { %211 = vmatmul.mubr.msk.bf16.vlgmr.msra.gmra.mrb[0].mxu0 %vm83_vm0, %v237_v8  ;;  %215 = vmatmul.mubr.msk.bf16.vlgmr.msra.gmra.mrb[0].mxu1 %vm83_vm0, %v238_v9 }
  0xe9   :  { %v212_v11 = vpop.f32.mrb[0].mxu0  ;;  %v216_v12 = vpop.f32.mrb[0].mxu1 }
  0xea   :  { %v143_v13 = vadd.f32 %v212_v11, %v177_v10  ;;  %v159_v14 = vadd.f32 %v216_v12, %v177_v10  ;;  %v134_v15 = vpop.f32.mrb[1].mxu0  ;;  %v150_v16 = vpop.f32.mrb[1].mxu1 }
  0xeb   :  { %v135_v17 = vadd.f32 %v177_v10, %v134_v15  ;;  %v151_v18 = vadd.f32 %v177_v10, %v150_v16  ;;  %v213_v19 = vpop.f32.mrb[2].mxu0  ;;  %v217_v20 = vpop.f32.mrb[2].mxu1 }
  0xec   :  { %167 = vst.msk [vmem:[%s323_s3 + $0x10] sm:$0xff] %vm164_vm2, %v143_v13  ;;  %v146_v21 = vadd.f32 %v213_v19, %v177_v10  ;;  %v137_v22 = vpop.f32.mrb[3].mxu0  ;;  %v153_v23 = vpop.f32.mrb[3].mxu1 }
  0xed   :  { %172 = vst.msk [vmem:[%s323_s3 + $0x30] sm:$0x1] %vm171_vm3, %v159_v14  ;;  %v138_v24 = vadd.f32 %v177_v10, %v137_v22  ;;  %v154_v25 = vadd.f32 %v177_v10, %v153_v23 }
  0xee   :  { %165 = vst.msk [vmem:[%s323_s3] sm:$0xff] %vm164_vm2, %v135_v17  ;;  %169 = vst.msk [vmem:[%s323_s3 + $0x20] sm:$0xff] %vm164_vm2, %v151_v18 }
  0xef   :  { %168 = vst.msk [vmem:[%s323_s3 + $0x18] sm:$0xff] %vm164_vm2, %v146_v21  ;;  %166 = vst.msk [vmem:[%s323_s3 + $0x8] sm:$0xff] %vm164_vm2, %v138_v24 }
  0xf0   :  { %170 = vst.msk [vmem:[%s323_s3 + $0x28] sm:$0xff] %vm164_vm2, %v154_v25 }

</bundles_post_ra>
